<compile_context>
chip_gen: v5e
topology: v5e:2x2
jax: 0.10.0
libtpu: 0.0.40
codegen_flags: <defaults>
</compile_context>

<pallas_src>
import functools
import math

import jax
import jax.numpy as jnp
from jax.experimental import pallas as pl
from jax.experimental.pallas import tpu as pltpu

_LANE_W = 512            # lane-dense slab width (multiple of 128 -> wide unmasked stores)
_MAX_BLOCK_ROWS = 2048   # 4 MiB f32 block; double-buffered in+out = 16 MiB << 32 MiB limit
_VMEM_LIMIT = 32 << 20   # safe on v5e (128 MiB phys), v6e (128 MiB), v7x (64 MiB)

_COMPILER_PARAMS = pltpu.CompilerParams(
    dimension_semantics=("parallel",),
    vmem_limit_bytes=_VMEM_LIMIT,
)


# ----------------------------------------------------------------------------
# Pallas kernels
# ----------------------------------------------------------------------------
def _copy_kernel(x_ref, o_ref):
    # Identity / pass-through: the base Model.forward performs no compute.
    o_ref[...] = x_ref[...]


def _kaiming_init_kernel(u_ref, o_ref, *, gain):
    # kaiming_normal_(mode='fan_out', nonlinearity='relu'): w ~ N(0, gain^2),
    # gain = sqrt(2 / fan_out) baked in as a trace-time constant.
    #
    # Box-Muller using BOTH outputs of each (u1, u2) pair: one log + one sqrt
    # produces TWO normals (z1 = r*cos, z2 = r*sin), halving the EUP work per
    # output element versus the cos-only variant.
    half = o_ref.shape[-1] // 2
    u1 = 1.0 - u_ref[:, :half]                 # uniform in (0, 1]  -> log is safe
    u2 = u_ref[:, half:]                       # uniform in [0, 1)
    r = gain * jnp.sqrt(-2.0 * jnp.log(u1))
    theta = (2.0 * math.pi) * u2
    o_ref[:, :half] = (r * jnp.cos(theta)).astype(o_ref.dtype)
    o_ref[:, half:] = (r * jnp.sin(theta)).astype(o_ref.dtype)


# ----------------------------------------------------------------------------
# Wrappers (glue: lane-dense slab view, tiled parallel grid)
# ----------------------------------------------------------------------------
def _block_rows(rows):
    """Pick a row-block size.

    * rows <= 8: full extent (any row count is legal when block == array dim).
    * otherwise: a multiple of 8, capped at _MAX_BLOCK_ROWS, and chosen so the
      grid has at least 2 blocks — keeps both TensorCores busy on v7x.
    """
    if rows <= 8:
        return rows
    half = ((pl.cdiv(rows, 2) + 7) // 8) * 8   # split in ~2, rounded up to sublane multiple
    return min(_MAX_BLOCK_ROWS, half)


def pallas_identity(x, force_copy=False):
    """Data path of the no-op forward.

    Default: short-circuit and return x unchanged — launching a copy kernel for an
    identity is pure HBM-bandwidth burn. With force_copy=True (a fresh buffer is
    semantically required) run a tiled lane-dense copy on a free reshape view of x,
    with no jnp.pad / slice and no input/output aliasing of the non-donated input.
    """
    if not force_copy:
        return x

    lane_w = next((lw for lw in (512, 256, 128) if x.size % lw == 0), None)
    if lane_w is None:
        # TODO(synk): ragged sizes would need an in-kernel masked tail store; returning
        # x is already a correct identity, so skip the padded copy entirely.
        return x

    slab = x.reshape(-1, lane_w)               # metadata-only view, no HBM traffic
    rows = slab.shape[0]
    br = _block_rows(rows)
    out = pl.pallas_call(
        _copy_kernel,
        out_shape=jax.ShapeDtypeStruct(slab.shape, slab.dtype),
        grid=(pl.cdiv(rows, br),),
        in_specs=[pl.BlockSpec((br, lane_w), lambda i: (i, 0))],
        out_specs=pl.BlockSpec((br, lane_w), lambda i: (i, 0)),
        compiler_params=_COMPILER_PARAMS,
    )(slab)
    return out.reshape(x.shape)


def pallas_kaiming_normal_fan_out(seed, weight_shape, dtype=jnp.float32):
    """kaiming_normal_(w, mode='fan_out', nonlinearity='relu') for a Conv2d weight
    of shape (out_ch, in_ch, kh, kw).

    Raw uniforms come from jax.random (portable: the TPU hardware PRNG primitives
    have no CPU/interpret lowering); the transcendental-heavy Box-Muller transform
    plus gain scaling run in-kernel, two normals per uniform pair.
    """
    out_ch, in_ch, kh, kw = weight_shape
    fan_out = out_ch * kh * kw
    gain = math.sqrt(2.0 / fan_out)

    n = out_ch * in_ch * kh * kw
    rows = pl.cdiv(n, _LANE_W)
    br = _block_rows(rows)

    # TODO(synk): on a pure-TPU deployment this uniform draw could move in-kernel
    # (pltpu.prng_seed / prng_random_bits) to make the kernel write-only.
    u = jax.random.uniform(jax.random.PRNGKey(seed), (rows, _LANE_W), dtype=jnp.float32)

    slab = pl.pallas_call(
        functools.partial(_kaiming_init_kernel, gain=gain),
        out_shape=jax.ShapeDtypeStruct((rows, _LANE_W), dtype),
        grid=(pl.cdiv(rows, br),),
        in_specs=[pl.BlockSpec((br, _LANE_W), lambda i: (i, 0))],
        out_specs=pl.BlockSpec((br, _LANE_W), lambda i: (i, 0)),
        compiler_params=_COMPILER_PARAMS,
    )(u)

    flat = slab.reshape(-1)
    if flat.shape[0] != n:                     # slice only the (< _LANE_W) padded tail
        flat = flat[:n]
    return flat.reshape(weight_shape)


# ----------------------------------------------------------------------------
# Model (mirrors the PyTorch base class semantics exactly)
# ----------------------------------------------------------------------------
class Model:
    def __init__(self):
        # Base class registers no parameters / submodules.
        self.conv_weights = {}

    def forward(self, *inputs):
        # PyTorch base class: `def forward(self, *input): pass`  -> returns None.
        # TODO(synk): the real compute lives in subclasses; nothing to translate here.
        return None

    def initialize(self):
        # Base class has no Conv2d / BatchNorm2d submodules -> no-op.
        # (Subclasses would use pallas_kaiming_normal_fan_out for Conv2d weights and
        #  constants 1 / 0 for BatchNorm2d weight / bias.)
        for name, (seed, shape) in self.conv_weights.items():
            self.conv_weights[name] = pallas_kaiming_normal_fan_out(seed, shape)
        return self


# ----------------------------------------------------------------------------
# Main
# ----------------------------------------------------------------------------
if __name__ == "__main__":
    key = jax.random.PRNGKey(0)
    (k_x,) = jax.random.split(key, 1)

    # Small NCHW input consistent with a segmentation model's forward signature.
    x = jax.random.normal(k_x, (2, 4, 16, 16), dtype=jnp.float32)

    model = Model()

    # Exact forward semantics: returns None (no compute in the base class).
    out = model.forward(x)
    assert out is None

    # No-op data path: short-circuit (no kernel launch, no HBM traffic).
    y0 = pallas_identity(x)
    assert y0 is x

    # Exercise the Pallas copy path explicitly (fresh-buffer pass-through).
    y = jax.block_until_ready(pallas_identity(x, force_copy=True))
    assert y.shape == x.shape and y.dtype == x.dtype
    assert bool(jnp.allclose(y, x))

    # Exercise the Pallas initialize() path on a synthetic Conv2d weight shape
    # (what a subclass's initialize() would do): kaiming_normal_ fan_out / relu.
    w = jax.block_until_ready(pallas_kaiming_normal_fan_out(0, (8, 4, 3, 3)))
    assert w.shape == (8, 4, 3, 3) and w.dtype == jnp.float32
    expected_std = math.sqrt(2.0 / (8 * 3 * 3))
    assert abs(float(jnp.std(w)) - expected_std) < 0.5 * expected_std
    assert abs(float(jnp.mean(w))) < 0.5 * expected_std

    print("KERNEL_OK")
</pallas_src>

<mosaic_0001>
module attributes {stable_mosaic.version = 11 : i64} {
  func.func @_copy_kernel(%arg0: i32, %arg1: memref<4x512xf32, #tpu.memory_space<vmem>>, %arg2: memref<4x512xf32, #tpu.memory_space<vmem>>) attributes {dimension_semantics = [#tpu.dimension_semantics<parallel>], iteration_bounds = array<i64: 1>, scalar_prefetch = 0 : i64, scratch_operands = 0 : i64, tpu.core_type = #tpu.core_type<tc>, window_params = [{transform_indices = @transform_0, window_bounds = array<i64: 4, 512>}, {transform_indices = @transform_1, window_bounds = array<i64: 4, 512>}]} {
    %c0 = arith.constant 0 : index
    %c0_0 = arith.constant 0 : index
    %0 = vector.load %arg1[%c0, %c0_0] : memref<4x512xf32, #tpu.memory_space<vmem>>, vector<4x512xf32>
    %c0_1 = arith.constant 0 : index
    %c0_2 = arith.constant 0 : index
    %1 = vector.load %arg2[%c0_1, %c0_2] : memref<4x512xf32, #tpu.memory_space<vmem>>, vector<4x512xf32>
    tpu.vector_store %arg2[%c0_1, %c0_2], %0 {strides = array<i32>} : memref<4x512xf32, #tpu.memory_space<vmem>>, vector<4x512xf32>,
    return
  }
  func.func @transform_0(%arg0: i32) -> (i32, i32) {
    %c0_i32 = arith.constant 0 : i32
    %c0_i32_0 = arith.constant 0 : i32
    return %arg0, %c0_i32 : i32, i32
  }
  func.func @transform_1(%arg0: i32) -> (i32, i32) {
    %c0_i32 = arith.constant 0 : i32
    %c0_i32_0 = arith.constant 0 : i32
    return %arg0, %c0_i32 : i32, i32
  }
}

</mosaic_0001>

<bundles_post_ra>
// kernel: tpu_custom_call.1
= control target key start
LH: loop header
LB: loop body
LE: loop exit
PB: predicated region body
PF: predicated region fallthrough
CT: control target
= control target key end

     0   :  { %6 = vsyncpa [#allocation3], 0  ;;  %s116_s0 = inlined_call_operand.hbm [shape: f32[4,512], index: 0, kind: input, shape index: {}]   ;;  %s117_s1 = inlined_call_operand.hbm [shape: f32[4,512], index: 1, kind: output, shape index: {}]  }
   0x1   :  { %7 = vsyncpa [#allocation4], 0  ;;  %s13_s8 = sshll.u32 %s116_s0, 4  ;;  %s98_s9 = smov [#allocation2]   ;;  %s14_s8 = int_to_ptr.hbm [resolvable:$true] %s13_s8 }
   0x2   :  { %s15_s10 = sshll.u32 %s98_s9, 4  ;;  %s16_s10 = int_to_ptr.vmem [resolvable:$true] %s15_s10 }
   0x3   :  { %18 = dma.hbm_to_vmem [thread:$0]  %s14_s8, 256, %s16_s10, [#allocation3]  }
   0x4   :  { %94 = dma.done.wait [#allocation3], 256  }
   0x5   :  { %95 = vsyncadd [#allocation3], 4294967040  ;;  %s99_s11 = smov [#allocation5]   ;;  %s34_s15 = sshll.u32 %s117_s1, 4  ;;  %v23_v0 = vld [vmem:[#allocation2] sm:$0xff]  ;;  %v24_v1 = vld [vmem:[#allocation2 + $0x8] sm:$0xff]  ;;  %s35_s15 = int_to_ptr.hbm [resolvable:$true] %s34_s15 }
   0x6   :  { %s32_s12 = sshll.u32 %s99_s11, 4  ;;  %25 = vst [vmem:[#allocation5] sm:$0xff] %v23_v0  ;;  %s33_s12 = int_to_ptr.vmem [resolvable:$true] %s32_s12 }
   0x7   :  { %26 = vst [vmem:[#allocation5 + $0x8] sm:$0xff] %v24_v1 }
   0x8   :  { %37 = dma.vmem_to_hbm [thread:$0]  %s33_s12, 256, %s35_s15, [#allocation4]  }
   0x9   :  { %96 = dma.done.wait [#allocation4], 256  }
   0xa   :  { %97 = vsyncadd [#allocation4], 4294967040 }
   0xb   :  { %42 = vsyncpa [#allocation3], 1 }
   0xc   :  { %43 = vsyncpa [#allocation4], 1 }

</bundles_post_ra>
